<compile_context>
chip_gen: v7x
topology: tpu7x:2x2x1
jax: 0.10.0
libtpu: 0.0.40
codegen_flags: <defaults>
</compile_context>

<pallas_src>
import math

import jax
import jax.numpy as jnp
from jax import lax
from jax.experimental import pallas as pl
from jax.experimental.pallas import tpu as pltpu

_NEG_INF = -1e30


def _vmem_limit_bytes():
    # Leave headroom for the compiler's own double-buffering/scratch:
    # ~48 MiB on v7x (64 MiB physical), ~96 MiB on v5e/v6e (128 MiB physical).
    try:
        cap = pltpu.get_tpu_info().vmem_capacity_bytes
    except Exception:
        cap = 64 * 1024 * 1024
    return int(cap) * 3 // 4


def _default_seq_tile():
    # v5e's MXU is 128x128 -> 128 tiles already fill M/N and quarter the
    # (NH,Tq,Tk) f32 intermediates.  v6e/v7x (256x256 MXU) keep 256.
    try:
        kind = jax.devices()[0].device_kind.lower()
        if "v5 lite" in kind or "v5e" in kind:
            return 128
    except Exception:
        pass
    return 256


def _pick_tile(n, preferred):
    """Largest multiple-of-8 tile <= preferred that divides n, else n (full)."""
    if n <= preferred:
        return n
    for t in range(preferred, 0, -8):
        if n % t == 0:
            return t
    return n


def _pick_hidden_tile(h, preferred=2048):
    """Largest multiple-of-128 tile <= preferred that divides h, else h."""
    if h <= preferred:
        return h
    for t in range(preferred, 0, -128):
        if h % t == 0:
            return t
    return h


def _layernorm(v, g, b, eps=1e-5):
    v = v.astype(jnp.float32)
    mu = jnp.mean(v, axis=-1, keepdims=True)
    var = jnp.mean((v - mu) ** 2, axis=-1, keepdims=True)
    return (v - mu) * lax.rsqrt(var + eps) * g + b


def _gelu_tanh(h):
    # tanh-approximate GELU (EUP-friendly; avoids erf lowering issues)
    return 0.5 * h * (1.0 + jnp.tanh(0.7978845608028654 * (h + 0.044715 * h * h * h)))


# ---------------------------------------------------------------------------
# Kernel 1: LayerNorm1 + fused QKV projection.  Emits q/k/v directly in the
# (tq, NH, hd) layout the attention kernel wants (bf16), so the wrapper does
# no split/transpose pass over HBM.
# ---------------------------------------------------------------------------
def _qkv_kernel(x_ref, g_ref, b_ref, w_ref, bias_ref, q_ref, k_ref, v_ref):
    d = x_ref.shape[2]
    nh, hd = q_ref.shape[2], q_ref.shape[3]
    xn = _layernorm(x_ref[0], g_ref[...], b_ref[...])               # (tq, D) f32
    qkv = jnp.dot(xn.astype(jnp.bfloat16), w_ref[...],              # bf16 x bf16
                  preferred_element_type=jnp.float32) + bias_ref[...]
    tq = qkv.shape[0]
    q_ref[0] = qkv[:, :d].reshape(tq, nh, hd).astype(jnp.bfloat16)
    k_ref[0] = qkv[:, d:2 * d].reshape(tq, nh, hd).astype(jnp.bfloat16)
    v_ref[0] = qkv[:, 2 * d:].reshape(tq, nh, hd).astype(jnp.bfloat16)


# ---------------------------------------------------------------------------
# Kernel 2: flash-style causal attention + W_o + residual.
# ---------------------------------------------------------------------------
def _attn_kernel(x_ref, q_ref, k_ref, v_ref, wo_ref, bo_ref, o_ref,
                 m_sc, l_sc, acc_sc):
    i = pl.program_id(1)                 # Q-tile index
    j = pl.program_id(2)                 # KV-tile index (reduction axis)
    tq = q_ref.shape[1]
    nh = q_ref.shape[2]
    hd = q_ref.shape[3]
    tk = k_ref.shape[1]
    scale = 1.0 / math.sqrt(hd)

    @pl.when(j == 0)
    def _():
        m_sc[...] = jnp.full_like(m_sc, _NEG_INF)
        l_sc[...] = jnp.zeros_like(l_sc)
        acc_sc[...] = jnp.zeros_like(acc_sc)

    def scores():
        q = q_ref[0]                                              # (tq, NH, hd) bf16
        k = k_ref[0]                                              # (tk, NH, hd) bf16
        return jnp.einsum("qhd,khd->hqk", q, k,
                          preferred_element_type=jnp.float32) * scale

    def online_update(s):
        v = v_ref[0]                                              # (tk, NH, hd) bf16
        m_prev = m_sc[...]                                        # (NH, tq, 1)
        m_new = jnp.maximum(m_prev, jnp.max(s, axis=-1, keepdims=True))
        alpha = jnp.exp(m_prev - m_new)
        p = jnp.exp(s - m_new)
        l_sc[...] = alpha * l_sc[...] + jnp.sum(p, axis=-1, keepdims=True)
        acc_sc[...] = alpha * acc_sc[...] + jnp.einsum(
            "hqk,khd->hqd", p.astype(jnp.bfloat16), v,
            preferred_element_type=jnp.float32)
        m_sc[...] = m_new

    first_row = i * tq
    last_row = (i + 1) * tq - 1
    first_col = j * tk
    last_col = (j + 1) * tk - 1

    # Tiles fully below the diagonal: no mask math at all.
    fully_visible = last_col <= first_row
    # Tiles straddling the diagonal: build the mask from program ids only.
    on_diagonal = jnp.logical_and(first_col <= last_row, last_col > first_row)
    # Tiles fully above the diagonal execute neither branch; their K/V
    # index_maps are clamped in the wrapper so no DMA is issued either.

    @pl.when(fully_visible)
    def _():
        online_update(scores())

    @pl.when(on_diagonal)
    def _():
        s = scores()
        row = first_row + lax.broadcasted_iota(jnp.int32, (tq, tk), 0)
        col = first_col + lax.broadcasted_iota(jnp.int32, (tq, tk), 1)
        s = jnp.where((col <= row)[None, :, :], s, _NEG_INF)
        online_update(s)

    @pl.when(j == pl.num_programs(2) - 1)
    def _():
        inv_l = pl.reciprocal(l_sc[...], approx=True)             # EUP, ~free
        attn = (acc_sc[...] * inv_l).astype(jnp.bfloat16)         # (NH, tq, hd)
        # One full-K matmul against the un-split W_o (fused head "concat").
        attn2 = jnp.transpose(attn, (1, 0, 2)).reshape(tq, nh * hd)
        proj = jnp.dot(attn2, wo_ref[...], preferred_element_type=jnp.float32)
        out = x_ref[0].astype(jnp.float32) + proj + bo_ref[...]
        o_ref[0] = out.astype(o_ref.dtype)


# ---------------------------------------------------------------------------
# Kernel 3: LayerNorm2 + MLP (hidden dim tiled over the last grid axis) +
# residual.  xn is computed once per row-tile and cached in VMEM; FC2 partial
# products accumulate in an f32 scratch.
# ---------------------------------------------------------------------------
def _mlp_kernel(x_ref, g_ref, b_ref, w1_ref, b1_ref, w2_ref, b2_ref, o_ref,
                xn_sc, acc_sc):
    j = pl.program_id(2)                 # hidden-dim tile index (reduction)

    @pl.when(j == 0)
    def _():
        xn = _layernorm(x_ref[0], g_ref[...], b_ref[...])
        xn_sc[...] = xn.astype(jnp.bfloat16)
        acc_sc[...] = jnp.zeros_like(acc_sc)

    h = jnp.dot(xn_sc[...], w1_ref[...],
                preferred_element_type=jnp.float32) + b1_ref[...]
    h = _gelu_tanh(h)
    acc_sc[...] += jnp.dot(h.astype(jnp.bfloat16), w2_ref[...],
                           preferred_element_type=jnp.float32)

    @pl.when(j == pl.num_programs(2) - 1)
    def _():
        out = x_ref[0].astype(jnp.float32) + acc_sc[...] + b2_ref[...]
        o_ref[0] = out.astype(o_ref.dtype)


# ---------------------------------------------------------------------------
# Wrapper
# ---------------------------------------------------------------------------
def transformer_block(x, params, num_heads, *, q_tile=None, kv_tile=None,
                      hidden_tile=None):
    (ln1_g, ln1_b, wqkv, bqkv, wo, bo, ln2_g, ln2_b, w1, b1, w2, b2) = params
    B, T, D = x.shape
    assert D % num_heads == 0
    H = 4 * D
    hd = D // num_heads

    seq_default = _default_seq_tile()
    tq = _pick_tile(T, q_tile if q_tile is not None else seq_default)
    tk = _pick_tile(T, kv_tile if kv_tile is not None else seq_default)
    th = _pick_hidden_tile(H, hidden_tile if hidden_tile is not None else 2048)
    nq, nk, nh_tiles = T // tq, T // tk, H // th
    vmem_limit = _vmem_limit_bytes()

    # bf16 weights: native MXU operand dtype, half the VMEM/HBM footprint.
    wqkv_bf = wqkv.astype(jnp.bfloat16)
    wo_bf = wo.astype(jnp.bfloat16)
    w1_bf = w1.astype(jnp.bfloat16)
    w2_bf = w2.astype(jnp.bfloat16)

    # ---- 1) LN1 + fused QKV projection ------------------------------------
    qkv_shape = jax.ShapeDtypeStruct((B, T, num_heads, hd), jnp.bfloat16)
    head_block = (1, tq, num_heads, hd)
    q, k, v = pl.pallas_call(
        _qkv_kernel,
        out_shape=(qkv_shape, qkv_shape, qkv_shape),
        grid_spec=pltpu.PrefetchScalarGridSpec(
            num_scalar_prefetch=0,
            grid=(B, nq),
            in_specs=[
                pl.BlockSpec((1, tq, D), lambda b, i: (b, i, 0)),      # x tile
                pl.BlockSpec((1, D), lambda b, i: (0, 0)),             # ln1 gamma
                pl.BlockSpec((1, D), lambda b, i: (0, 0)),             # ln1 beta
                pl.BlockSpec((D, 3 * D), lambda b, i: (0, 0)),         # W_qkv
                pl.BlockSpec((1, 3 * D), lambda b, i: (0, 0)),         # b_qkv
            ],
            out_specs=(
                pl.BlockSpec(head_block, lambda b, i: (b, i, 0, 0)),
                pl.BlockSpec(head_block, lambda b, i: (b, i, 0, 0)),
                pl.BlockSpec(head_block, lambda b, i: (b, i, 0, 0)),
            ),
        ),
        compiler_params=pltpu.CompilerParams(
            dimension_semantics=("parallel", "parallel"),
            vmem_limit_bytes=vmem_limit),
    )(x, ln1_g, ln1_b, wqkv_bf, bqkv)

    # ---- 2) flash attention + W_o + residual ------------------------------
    # Clamp the KV block index to the last causally-valid tile for this Q
    # tile: skipped-above-diagonal steps return the same block index, so
    # Pallas issues no DMA for them.
    def kv_index(b, i, j):
        last_valid = ((i + 1) * tq - 1) // tk
        return (b, jnp.minimum(j, last_valid), 0, 0)

    x1 = pl.pallas_call(
        _attn_kernel,
        out_shape=jax.ShapeDtypeStruct((B, T, D), x.dtype),
        grid_spec=pltpu.PrefetchScalarGridSpec(
            num_scalar_prefetch=0,
            grid=(B, nq, nk),
            in_specs=[
                pl.BlockSpec((1, tq, D), lambda b, i, j: (b, i, 0)),         # x (residual)
                pl.BlockSpec((1, tq, num_heads, hd),
                             lambda b, i, j: (b, i, 0, 0)),                  # q
                pl.BlockSpec((1, tk, num_heads, hd), kv_index),              # k
                pl.BlockSpec((1, tk, num_heads, hd), kv_index),              # v
                pl.BlockSpec((D, D), lambda b, i, j: (0, 0)),                # W_o
                pl.BlockSpec((1, D), lambda b, i, j: (0, 0)),                # b_o
            ],
            out_specs=pl.BlockSpec((1, tq, D), lambda b, i, j: (b, i, 0)),
            scratch_shapes=[
                pltpu.VMEM((num_heads, tq, 1), jnp.float32),    # running max
                pltpu.VMEM((num_heads, tq, 1), jnp.float32),    # running denom
                pltpu.VMEM((num_heads, tq, hd), jnp.float32),   # output accumulator
            ],
        ),
        compiler_params=pltpu.CompilerParams(
            dimension_semantics=("parallel", "parallel", "arbitrary"),
            vmem_limit_bytes=vmem_limit),
    )(x, q, k, v, wo_bf, bo)

    # ---- 3) LN2 + MLP (H-tiled) + residual --------------------------------
    out = pl.pallas_call(
        _mlp_kernel,
        out_shape=jax.ShapeDtypeStruct((B, T, D), x.dtype),
        grid_spec=pltpu.PrefetchScalarGridSpec(
            num_scalar_prefetch=0,
            grid=(B, nq, nh_tiles),
            in_specs=[
                pl.BlockSpec((1, tq, D), lambda b, i, j: (b, i, 0)),   # x1 tile
                pl.BlockSpec((1, D), lambda b, i, j: (0, 0)),          # ln2 gamma
                pl.BlockSpec((1, D), lambda b, i, j: (0, 0)),          # ln2 beta
                pl.BlockSpec((D, th), lambda b, i, j: (0, j)),         # W_fc1 tile
                pl.BlockSpec((1, th), lambda b, i, j: (0, j)),         # b_fc1 tile
                pl.BlockSpec((th, D), lambda b, i, j: (j, 0)),         # W_fc2 tile
                pl.BlockSpec((1, D), lambda b, i, j: (0, 0)),          # b_fc2
            ],
            out_specs=pl.BlockSpec((1, tq, D), lambda b, i, j: (b, i, 0)),
            scratch_shapes=[
                pltpu.VMEM((tq, D), jnp.bfloat16),    # cached LN2(x1) tile
                pltpu.VMEM((tq, D), jnp.float32),     # FC2 accumulator
            ],
        ),
        compiler_params=pltpu.CompilerParams(
            dimension_semantics=("parallel", "parallel", "arbitrary"),
            vmem_limit_bytes=vmem_limit),
    )(x1, ln2_g, ln2_b, w1_bf, b1, w2_bf, b2)
    return out


# ---------------------------------------------------------------------------
# Pure-JAX f32 reference (same math, standard softmax) for correctness checks.
# ---------------------------------------------------------------------------
def reference_block(x, params, num_heads):
    (ln1_g, ln1_b, wqkv, bqkv, wo, bo, ln2_g, ln2_b, w1, b1, w2, b2) = params
    B, T, D = x.shape
    hd = D // num_heads

    xn = _layernorm(x, ln1_g, ln1_b)
    qkv = xn @ wqkv + bqkv
    q, k, v = qkv[..., :D], qkv[..., D:2 * D], qkv[..., 2 * D:]
    q = q.reshape(B, T, num_heads, hd).transpose(0, 2, 1, 3)
    k = k.reshape(B, T, num_heads, hd).transpose(0, 2, 1, 3)
    v = v.reshape(B, T, num_heads, hd).transpose(0, 2, 1, 3)
    s = jnp.einsum("bhqd,bhkd->bhqk", q, k) / math.sqrt(hd)
    causal = jnp.tril(jnp.ones((T, T), dtype=bool))
    s = jnp.where(causal, s, _NEG_INF)
    p = jax.nn.softmax(s, axis=-1)
    a = jnp.einsum("bhqk,bhkd->bhqd", p, v).transpose(0, 2, 1, 3).reshape(B, T, D)
    x1 = x + (a @ wo + bo)

    xn2 = _layernorm(x1, ln2_g, ln2_b)
    h = _gelu_tanh(xn2 @ w1 + b1)
    return x1 + (h @ w2 + b2)


def init_params(key, d_model):
    H = 4 * d_model
    ks = jax.random.split(key, 6)
    std = 0.02
    ln1_g = jnp.ones((1, d_model), jnp.float32)
    ln1_b = jnp.zeros((1, d_model), jnp.float32)
    ln2_g = jnp.ones((1, d_model), jnp.float32)
    ln2_b = jnp.zeros((1, d_model), jnp.float32)
    wqkv = std * jax.random.normal(ks[0], (d_model, 3 * d_model), jnp.float32)
    bqkv = jnp.zeros((1, 3 * d_model), jnp.float32)
    wo = std * jax.random.normal(ks[1], (d_model, d_model), jnp.float32)
    bo = jnp.zeros((1, d_model), jnp.float32)
    w1 = std * jax.random.normal(ks[2], (d_model, H), jnp.float32)
    b1 = jnp.zeros((1, H), jnp.float32)
    w2 = std * jax.random.normal(ks[3], (H, d_model), jnp.float32)
    b2 = jnp.zeros((1, d_model), jnp.float32)
    return (ln1_g, ln1_b, wqkv, bqkv, wo, bo, ln2_g, ln2_b, w1, b1, w2, b2)


if __name__ == "__main__":
    B, T, D, NUM_HEADS = 2, 8, 32, 4
    key = jax.random.PRNGKey(0)
    kx, kx2, kp = jax.random.split(key, 3)
    params = init_params(kp, D)

    # Single-tile case (T fits one tile).
    x = jax.random.normal(kx, (B, T, D), jnp.float32)
    out = jax.block_until_ready(transformer_block(x, params, NUM_HEADS))
    ref = reference_block(x, params, NUM_HEADS)
    assert out.shape == (B, T, D)
    err = float(jnp.max(jnp.abs(out - ref)))
    assert err < 1e-2, err

    # Multi-tile case: exercises the online-softmax KV loop, the clamped
    # (no-DMA) above-diagonal path, the mask-free below-diagonal path, and
    # the diagonal-tile mask path.
    T2 = 32
    x2 = jax.random.normal(kx2, (B, T2, D), jnp.float32)
    out2 = jax.block_until_ready(
        transformer_block(x2, params, NUM_HEADS, q_tile=16, kv_tile=16))
    ref2 = reference_block(x2, params, NUM_HEADS)
    err2 = float(jnp.max(jnp.abs(out2 - ref2)))
    assert err2 < 1e-2, err2

    print("KERNEL_OK")
</pallas_src>

<mosaic_0001>
module attributes {stable_mosaic.version = 11 : i64} {
  func.func @_qkv_kernel(%arg0: i32, %arg1: i32, %arg2: memref<1x8x32xf32, #tpu.memory_space<vmem>>, %arg3: memref<1x32xf32, #tpu.memory_space<vmem>>, %arg4: memref<1x32xf32, #tpu.memory_space<vmem>>, %arg5: memref<32x96xbf16, #tpu.memory_space<vmem>>, %arg6: memref<1x96xf32, #tpu.memory_space<vmem>>, %arg7: memref<1x8x4x8xbf16, #tpu.memory_space<vmem>>, %arg8: memref<1x8x4x8xbf16, #tpu.memory_space<vmem>>, %arg9: memref<1x8x4x8xbf16, #tpu.memory_space<vmem>>) attributes {dimension_semantics = [#tpu.dimension_semantics<parallel>, #tpu.dimension_semantics<parallel>], iteration_bounds = array<i64: 2, 1>, scalar_prefetch = 0 : i64, scratch_operands = 0 : i64, tpu.core_type = #tpu.core_type<tc>, window_params = [{transform_indices = @transform_0, window_bounds = array<i64: 1, 8, 32>}, {pipeline_mode = #tpu.pipeline_mode<synchronous>, transform_indices = @transform_1, window_bounds = array<i64: 1, 32>}, {pipeline_mode = #tpu.pipeline_mode<synchronous>, transform_indices = @transform_2, window_bounds = array<i64: 1, 32>}, {pipeline_mode = #tpu.pipeline_mode<synchronous>, transform_indices = @transform_3, window_bounds = array<i64: 32, 96>}, {pipeline_mode = #tpu.pipeline_mode<synchronous>, transform_indices = @transform_4, window_bounds = array<i64: 1, 96>}, {transform_indices = @transform_5, window_bounds = array<i64: 1, 8, 4, 8>}, {transform_indices = @transform_6, window_bounds = array<i64: 1, 8, 4, 8>}, {transform_indices = @transform_7, window_bounds = array<i64: 1, 8, 4, 8>}]} {
    %c0 = arith.constant 0 : index
    %c0_0 = arith.constant 0 : index
    %c0_1 = arith.constant 0 : index
    %0 = vector.load %arg2[%c0, %c0_0, %c0_1] : memref<1x8x32xf32, #tpu.memory_space<vmem>>, vector<1x8x32xf32>
    %1 = vector.shape_cast %0 : vector<1x8x32xf32> to vector<8x32xf32>
    %c0_2 = arith.constant 0 : index
    %c0_3 = arith.constant 0 : index
    %2 = vector.load %arg3[%c0_2, %c0_3] : memref<1x32xf32, #tpu.memory_space<vmem>>, vector<1x32xf32>
    %c0_4 = arith.constant 0 : index
    %c0_5 = arith.constant 0 : index
    %3 = vector.load %arg4[%c0_4, %c0_5] : memref<1x32xf32, #tpu.memory_space<vmem>>, vector<1x32xf32>
    %cst = arith.constant dense<0.000000e+00> : vector<8xf32>
    %4 = vector.multi_reduction <add>, %1, %cst [1] : vector<8x32xf32> to vector<8xf32>
    %5 = vector.shape_cast %4 : vector<8xf32> to vector<8x1xf32>
    %cst_6 = arith.constant 3.200000e+01 : f32
    %6 = vector.broadcast %cst_6 : f32 to vector<8x1xf32>
    %7 = arith.divf %5, %6 : vector<8x1xf32>
    %8 = vector.broadcast %7 : vector<8x1xf32> to vector<8x32xf32>
    %9 = arith.subf %1, %8 : vector<8x32xf32>
    %10 = arith.mulf %9, %9 : vector<8x32xf32>
    %cst_7 = arith.constant dense<0.000000e+00> : vector<8xf32>
    %11 = vector.multi_reduction <add>, %10, %cst_7 [1] : vector<8x32xf32> to vector<8xf32>
    %12 = vector.shape_cast %11 : vector<8xf32> to vector<8x1xf32>
    %cst_8 = arith.constant 3.200000e+01 : f32
    %13 = vector.broadcast %cst_8 : f32 to vector<8x1xf32>
    %14 = arith.divf %12, %13 : vector<8x1xf32>
    %15 = vector.broadcast %7 : vector<8x1xf32> to vector<8x32xf32>
    %16 = arith.subf %1, %15 : vector<8x32xf32>
    %cst_9 = arith.constant 9.99999974E-6 : f32
    %17 = vector.broadcast %cst_9 : f32 to vector<8x1xf32>
    %18 = arith.addf %14, %17 : vector<8x1xf32>
    %19 = math.rsqrt %18 : vector<8x1xf32>
    %20 = vector.broadcast %19 : vector<8x1xf32> to vector<8x32xf32>
    %21 = arith.mulf %16, %20 : vector<8x32xf32>
    %22 = vector.broadcast %2 : vector<1x32xf32> to vector<8x32xf32>
    %23 = arith.mulf %21, %22 : vector<8x32xf32>
    %24 = vector.broadcast %3 : vector<1x32xf32> to vector<8x32xf32>
    %25 = arith.addf %23, %24 : vector<8x32xf32>
    %26 = arith.truncf %25 : vector<8x32xf32> to vector<8x32xbf16>
    %c0_10 = arith.constant 0 : index
    %c0_11 = arith.constant 0 : index
    %27 = vector.load %arg5[%c0_10, %c0_11] : memref<32x96xbf16, #tpu.memory_space<vmem>>, vector<32x96xbf16>
    %cst_12 = arith.constant dense<0.000000e+00> : vector<8x96xf32>
    %28 = tpu.matmul %26, %27, %cst_12 {dimension_numbers = #tpu.dot_dimension_numbers<[1], [0], [0], [1], [0, 0, 1, 1], [], []>} : vector<8x32xbf16>, vector<32x96xbf16>, vector<8x96xf32> -> vector<8x96xf32>
    %c0_13 = arith.constant 0 : index
    %c0_14 = arith.constant 0 : index
    %29 = vector.load %arg6[%c0_13, %c0_14] : memref<1x96xf32, #tpu.memory_space<vmem>>, vector<1x96xf32>
    %30 = vector.broadcast %29 : vector<1x96xf32> to vector<8x96xf32>
    %31 = arith.addf %28, %30 : vector<8x96xf32>
    %32 = vector.extract_strided_slice %31 {offsets = [0, 0], sizes = [8, 32], strides = [1, 1]} : vector<8x96xf32> to vector<8x32xf32>
    %33 = vector.shape_cast %32 : vector<8x32xf32> to vector<8x4x8xf32>
    %34 = arith.truncf %33 : vector<8x4x8xf32> to vector<8x4x8xbf16>
    %c0_15 = arith.constant 0 : index
    %c0_16 = arith.constant 0 : index
    %c0_17 = arith.constant 0 : index
    %c0_18 = arith.constant 0 : index
    %35 = vector.load %arg7[%c0_15, %c0_16, %c0_17, %c0_18] : memref<1x8x4x8xbf16, #tpu.memory_space<vmem>>, vector<1x8x4x8xbf16>
    %36 = vector.shape_cast %35 : vector<1x8x4x8xbf16> to vector<8x4x8xbf16>
    %37 = vector.shape_cast %34 : vector<8x4x8xbf16> to vector<1x8x4x8xbf16>
    tpu.vector_store %arg7[%c0_15, %c0_16, %c0_17, %c0_18], %37 {strides = array<i32>} : memref<1x8x4x8xbf16, #tpu.memory_space<vmem>>, vector<1x8x4x8xbf16>,
    %38 = vector.extract_strided_slice %31 {offsets = [0, 32], sizes = [8, 32], strides = [1, 1]} : vector<8x96xf32> to vector<8x32xf32>
    %39 = vector.shape_cast %38 : vector<8x32xf32> to vector<8x4x8xf32>
    %40 = arith.truncf %39 : vector<8x4x8xf32> to vector<8x4x8xbf16>
    %c0_19 = arith.constant 0 : index
    %c0_20 = arith.constant 0 : index
    %c0_21 = arith.constant 0 : index
    %c0_22 = arith.constant 0 : index
    %41 = vector.load %arg8[%c0_19, %c0_20, %c0_21, %c0_22] : memref<1x8x4x8xbf16, #tpu.memory_space<vmem>>, vector<1x8x4x8xbf16>
    %42 = vector.shape_cast %41 : vector<1x8x4x8xbf16> to vector<8x4x8xbf16>
    %43 = vector.shape_cast %40 : vector<8x4x8xbf16> to vector<1x8x4x8xbf16>
    tpu.vector_store %arg8[%c0_19, %c0_20, %c0_21, %c0_22], %43 {strides = array<i32>} : memref<1x8x4x8xbf16, #tpu.memory_space<vmem>>, vector<1x8x4x8xbf16>,
    %44 = vector.extract_strided_slice %31 {offsets = [0, 64], sizes = [8, 32], strides = [1, 1]} : vector<8x96xf32> to vector<8x32xf32>
    %45 = vector.shape_cast %44 : vector<8x32xf32> to vector<8x4x8xf32>
    %46 = arith.truncf %45 : vector<8x4x8xf32> to vector<8x4x8xbf16>
    %c0_23 = arith.constant 0 : index
    %c0_24 = arith.constant 0 : index
    %c0_25 = arith.constant 0 : index
    %c0_26 = arith.constant 0 : index
    %47 = vector.load %arg9[%c0_23, %c0_24, %c0_25, %c0_26] : memref<1x8x4x8xbf16, #tpu.memory_space<vmem>>, vector<1x8x4x8xbf16>
    %48 = vector.shape_cast %47 : vector<1x8x4x8xbf16> to vector<8x4x8xbf16>
    %49 = vector.shape_cast %46 : vector<8x4x8xbf16> to vector<1x8x4x8xbf16>
    tpu.vector_store %arg9[%c0_23, %c0_24, %c0_25, %c0_26], %49 {strides = array<i32>} : memref<1x8x4x8xbf16, #tpu.memory_space<vmem>>, vector<1x8x4x8xbf16>,
    return
  }
  func.func @transform_0(%arg0: i32, %arg1: i32) -> (i32, i32, i32) {
    %c0_i32 = arith.constant 0 : i32
    %c0_i32_0 = arith.constant 0 : i32
    return %arg0, %arg1, %c0_i32 : i32, i32, i32
  }
  func.func @transform_1(%arg0: i32, %arg1: i32) -> (i32, i32) {
    %c0_i32 = arith.constant 0 : i32
    %c0_i32_0 = arith.constant 0 : i32
    %c0_i32_1 = arith.constant 0 : i32
    return %c0_i32, %c0_i32_0 : i32, i32
  }
  func.func @transform_2(%arg0: i32, %arg1: i32) -> (i32, i32) {
    %c0_i32 = arith.constant 0 : i32
    %c0_i32_0 = arith.constant 0 : i32
    %c0_i32_1 = arith.constant 0 : i32
    return %c0_i32, %c0_i32_0 : i32, i32
  }
  func.func @transform_3(%arg0: i32, %arg1: i32) -> (i32, i32) {
    %c0_i32 = arith.constant 0 : i32
    %c0_i32_0 = arith.constant 0 : i32
    %c0_i32_1 = arith.constant 0 : i32
    return %c0_i32, %c0_i32_0 : i32, i32
  }
  func.func @transform_4(%arg0: i32, %arg1: i32) -> (i32, i32) {
    %c0_i32 = arith.constant 0 : i32
    %c0_i32_0 = arith.constant 0 : i32
    %c0_i32_1 = arith.constant 0 : i32
    return %c0_i32, %c0_i32_0 : i32, i32
  }
  func.func @transform_5(%arg0: i32, %arg1: i32) -> (i32, i32, i32, i32) {
    %c0_i32 = arith.constant 0 : i32
    %c0_i32_0 = arith.constant 0 : i32
    %c0_i32_1 = arith.constant 0 : i32
    return %arg0, %arg1, %c0_i32, %c0_i32_0 : i32, i32, i32, i32
  }
  func.func @transform_6(%arg0: i32, %arg1: i32) -> (i32, i32, i32, i32) {
    %c0_i32 = arith.constant 0 : i32
    %c0_i32_0 = arith.constant 0 : i32
    %c0_i32_1 = arith.constant 0 : i32
    return %arg0, %arg1, %c0_i32, %c0_i32_0 : i32, i32, i32, i32
  }
  func.func @transform_7(%arg0: i32, %arg1: i32) -> (i32, i32, i32, i32) {
    %c0_i32 = arith.constant 0 : i32
    %c0_i32_0 = arith.constant 0 : i32
    %c0_i32_1 = arith.constant 0 : i32
    return %arg0, %arg1, %c0_i32, %c0_i32_0 : i32, i32, i32, i32
  }
}

</mosaic_0001>

<bundles_post_ra>
// kernel: tpu_custom_call.1
= control target key start
LH: loop header
LB: loop body
LE: loop exit
PB: predicated region body
PF: predicated region fallthrough
CT: control target
= control target key end

     0   :  { %s1756_s0 = inlined_call_operand.hbm [shape: f32[2,8,32], index: 0, kind: input, shape index: {}]   ;;  %s1757_s1 = inlined_call_operand.vmem [shape: f32[1,32], index: 1, kind: input, shape index: {}]   ;;  %s1758_s2 = inlined_call_operand.vmem [shape: f32[1,32], index: 2, kind: input, shape index: {}]   ;;  %s1759_s3 = inlined_call_operand.hbm [shape: bf16[32,96], index: 3, kind: input, shape index: {}]   ;;  %s1760_s4 = inlined_call_operand.vmem [shape: f32[1,96], index: 4, kind: input, shape index: {}]   ;;  %s1761_s5 = inlined_call_operand.hbm [shape: bf16[2,8,4,8], index: 5, kind: output, shape index: {0}]   ;;  %s1762_s6 = inlined_call_operand.hbm [shape: bf16[2,8,4,8], index: 6, kind: output, shape index: {1}]   ;;  %s1763_s7 = inlined_call_operand.hbm [shape: bf16[2,8,4,8], index: 7, kind: output, shape index: {2}]  }
   0x1   :  { %1769 = sst [smem:[#allocation16_spill]] %s1759_s3 }
   0x2   :  { %13 = vsyncpa [#allocation3], 0 }
   0x3   :  { %15 = vsyncpa [#allocation3 + $0x1], 0 }
   0x4   :  { %16 = vsyncpa [#allocation6], 0 }
   0x5   :  { %17 = vsyncpa [#allocation4], 0 }
   0x6   :  { %19 = vsyncpa [#allocation4 + $0x1], 0 }
   0x7   :  { %20 = vsyncpa [#allocation9], 0 }
   0x8   :  { %22 = vsyncpa [#allocation9 + $0x1], 0  ;;  %s1370_s24 = smov 0   ;;  %s1372_s25 = smov 0  }
   0x9   :  { %s1374_s26 = smov 0   ;;  %s1376_s27 = smov 0  }
   0xa   :  { %s1378_s28 = smov 0   ;;  %s1380_s29 = smov 0  }
   0xb LB: > { %s1401_s30 = sadd.s32 4294967295, %s1310_s29   ;;  %s1767_s8 = sadd.s32 4294967294, %s1310_s29   ;;  %s1310_s29 = sphi %s1380_s29, %s28_s29   ;;  %s1306_s28 = sphi %s1378_s28, %s1792_s28   ;;  %s1302_s27 = sphi %s1376_s27, %s1791_s27   ;;  %s1298_s26 = sphi %s1374_s26, %s1790_s26   ;;  %s1294_s25 = sphi %s1372_s25, %s1789_s25   ;;  %s1290_s24 = sphi %s1370_s24, %s1788_s24  }
   0xc   : > { %p62_p0 = scmp.ne.s32.totalorder %s1294_s25, %s1290_s24  ;;  %p1764_p1 = scmp.eq.s32.totalorder %s1401_s30, 0 }
   0xd   : > { %p178_p3 = scmp.eq.s32.totalorder %s1767_s8, 1  ;;  %p964_p5 = scmp.ge.s32.totalorder %s1310_s29, 1 }
   0xe   : > { %p1412_p4 = por %p1764_p1, %p62_p0  ;;  %p241_p7 = scmp.lt.s32.totalorder %s1310_s29, 3 }
   0xf   : > { %p1417_p6 = por %p178_p3, %p62_p0  ;;  %s1312_s12 = smov [#allocation5]  }
  0x10   : > { %s1770_s9 = scalar_select %p1412_p4, 1, 0 }
  0x11   : > { %s1771_s10 = scalar_select %p1417_p6, 1, 0 }
  0x12   : > { %p1422_p8 = pnand %p964_p5, %p241_p7  ;;  %s259_s13 = sshll.u32 %s1312_s12, 4  ;;  %s260_s13 = int_to_ptr.vmem [resolvable:$true] %s259_s13 }
  0x13   : > { %s40_s15 = sadd.s32 1, %s1306_s28  ;;  %s1774_s3 = sld [smem:[#allocation16_spill]] }
  0x14   : > { %s1772_s11 = scalar_select %p1422_p8, 1, 0 }
  0x15   : > { %p1018_p9 = pneg %p1422_p8 }
  0x17   : > { %p1431_p11 = pnand %p1018_p9, %p1764_p1 }
  0x19   : > { %s1106_s18 = scalar_lea.hbm %s1774_s3, 256  ;;  %p1108_p13 = pneg %p1431_p11 }
  0x1a   : > { %p1107_p12 = scmp.ne.s32.totalorder %s1774_s3, %s1106_s18  ;;  %p1113_p5 = scmp.lt.u32.totalorder %s1106_s18, %s1774_s3 }
  0x1c   : > { %p1109_p0 = pnand %p1108_p13, %p1107_p12 }
  0x1e   : > { %p1110_p3 = pneg %p1109_p0 }
  0x20   : > { %p1115_p7 = pnand %p1113_p5, %p1110_p3 }
  0x22   : > { %1118 = shalt.err (!%p1115_p7)
}
  0x23   : > { %s1119_s23 = scalar_lea.vmem %s260_s13, 256  ;;  %p1127_p2 = scmp.lt.s32.totalorder %s260_s13, %s260_s13 }
  0x24   : > { %p1120_p9 = scmp.ne.s32.totalorder %s260_s13, %s1119_s23  ;;  %p1128_p6 = scmp.lt.s32.totalorder %s1119_s23, %s1119_s23 }
  0x26   : > { %p1122_p10 = pnand %p1120_p9, %p1108_p13  ;;  %p1129_p4 = por %p1128_p6, %p1127_p2 }
  0x28   : > { %p1123_p1 = pneg %p1122_p10 }
  0x2a   : > { %p1130_p8 = pnand %p1129_p4, %p1123_p1 }
  0x2c   : > { %1133 = shalt.err (!%p1130_p8)
}
  0x2d   : > { %s1313_s12 = smov 64   ;;  %s1314_s16 = smov 4  }
  0x2e   : > { %1021 = dma.hbm_to_vmem [thread:$0]  (!%p1431_p11), %s1774_s3, 256, %s260_s13, [#allocation6], %s1313_s12, %s1313_s12, %s1314_s16  }
  0x2f   : > { %p42_p1 = scmp.ge.s32.totalorder %s40_s15, 2  ;;  %s49_s19 = sadd.s32 1, %s1298_s26 }
  0x30   : > { %p56_p2 = scmp.ne.s32.totalorder %s1298_s26, %s1294_s25  ;;  %p57_p4 = scmp.eq.s32.totalorder %s1310_s29, 0 }
  0x31   : > { %s1794_s15 = smov (%p42_p1, %s40_s15), 0  ;;  %p1777_p8 = scmp.eq.s32.totalorder %s1401_s30, 1 }
  0x32   : > { %1775 = sst [smem:[#allocation15_spill]] %s1794_s15  ;;  %p1458_p6 = por %p57_p4, %p56_p2 }
  0x33   : > { %p1464_p10 = por %p1777_p8, %p56_p2  ;;  %s44_s14 = ssub.s32 %s1306_s28, %s1794_s15 }
  0x34   : > { %p1037_p12 = scmp.lt.s32.totalorder %s1310_s29, 2  ;;  %p47_p11 = scmp.eq.s32.totalorder %s44_s14, 0 }
  0x35   : > { %s276_s13 = sand.u32 1, %s1298_s26   ;;  %s968_s12 = sshll.u32 %s1306_s28, 7 }
  0x36   : > { %s967_s22 = sshll.u32 %s276_s13, 3  ;;  %s1479_s18 = scalar_lea.hbm %s1756_s0, %s968_s12 }
  0x37   : > { %s1473_s23 = scalar_select %p47_p11, %s1298_s26, %s49_s19  }
  0x38   : > { %s280_s8 = scalar_lea.vmem [#allocation2], %s967_s22  ;;  %p1485_p13 = pnand %p1037_p12, %p1458_p6 }
  0x39   : > { %s288_s3 = sshll.u32 %s280_s8, 4  ;;  %s277_s19 = scalar_lea.sflag [#allocation3], %s276_s13  ;;  %s1481_s3 = int_to_ptr.vmem [resolvable:$true] %s288_s3 }
  0x3a   : > { %s1134_s15 = scalar_lea.hbm %s1479_s18, 128  ;;  %p1136_p3 = pneg %p1485_p13 }
  0x3b   : > { %p1135_p0 = scmp.ne.s32.totalorder %s1479_s18, %s1134_s15  ;;  %s1139_s12 = scalar_lea.hbm %s1756_s0, 256 }
  0x3c   : > { %p1140_p9 = scmp.lt.u32.totalorder %s1479_s18, %s1756_s0  ;;  %p1141_p1 = scmp.lt.u32.totalorder %s1139_s12, %s1134_s15 }
  0x3d   : > { %p1137_p5 = pnand %p1136_p3, %p1135_p0  ;;  %p1143_p4 = scmp.lt.u32.totalorder %s1134_s15, %s1479_s18 }
  0x3e   : > { %p1142_p2 = por %p1141_p1, %p1140_p9 }
  0x3f   : > { %p1138_p7 = pneg %p1137_p5 }
  0x40   : > { %p1144_p6 = por %p1143_p4, %p1142_p2 }
  0x42   : > { %p1145_p8 = pnand %p1144_p6, %p1138_p7 }
  0x44   : > { %1148 = shalt.err (!%p1145_p8)
}
  0x45   : > { %s1149_s13 = scalar_lea.vmem %s1481_s3, 128  ;;  %s1315_s17 = smov [#allocation2]  }
  0x46   : > { %p1150_p12 = scmp.ne.s32.totalorder %s1481_s3, %s1149_s13  ;;  %s1154_s22 = sshll.u32 %s1315_s17, 4  ;;  %s1155_s22 = int_to_ptr.vmem [resolvable:$false] %s1154_s22 }
  0x47   : > { %s1156_s8 = scalar_lea.vmem %s1155_s22, 256  ;;  %p1157_p5 = scmp.lt.s32.totalorder %s1481_s3, %s1155_s22 }
  0x48   : > { %p1152_p11 = pnand %p1150_p12, %p1136_p3  ;;  %p1158_p9 = scmp.lt.s32.totalorder %s1156_s8, %s1149_s13 }
  0x4a   : > { %p1153_p0 = pneg %p1152_p11  ;;  %p1159_p1 = por %p1158_p9, %p1157_p5 }
  0x4c   : > { %p1160_p2 = pnand %p1159_p1, %p1153_p0 }
  0x4e   : > { %1163 = shalt.err (!%p1160_p2)
}
  0x4f   : > { %1025 = dma.hbm_to_vmem [thread:$0]  (!%p1485_p13), %s1479_s18, 128, %s1481_s3, %s277_s19  }
  0x50   : > { %p1780_p7 = scmp.ne.s32.totalorder %s1772_s11, 0 }
  0x51   : > { %s1517_s15 = sand.u32 (!%p1780_p7), 1, %s1294_s25   ;;  %p1781_p3 = scmp.ne.s32.totalorder (!%p1780_p7), %s1770_s9, 0 }
  0x52   : > { %297 = sbr.rel (%p1780_p7) target bundleno = 913 (0x391), region = 40  ;;  %s970_s12 = sshll.u32 (!%p1780_p7), %s1517_s15, 3 }
  0x53   : > { %s300_s20 = scalar_lea.sflag (!%p1780_p7), [#allocation3], %s1517_s15  ;;  %s303_s16 = scalar_lea.vmem (!%p1780_p7), [#allocation2], %s970_s12 }
  0x59   : > { %1273 = dma.done.wait (%p1781_p3), %s300_s20, 128  }
  0x5a   : > { %1275 = vsyncadd (%p1781_p3), %s300_s20, 4294967168  ;;  %p1782_p4 = scmp.eq.s32.totalorder %s1401_s30, 0 }
  0x5c   : > { %1277 = dma.done.wait (%p1782_p4), [#allocation6], 256   ;;  %p1783_p13 = pmov %p1782_p4 }
  0x5d   : > { %vm355_vm0 = vcmask 261120   ;;  %v352_v0 = vld [vmem:[%s303_s16] sm:$0xff]  ;;  %v1102_v7 = vld [vmem:[#allocation5] sm:$0xff]   ;;  %v1316_v8 = vmov 0.0   ;;  %vm1317_vm1 = vmmov 0   ;;  %v1103_v9 = vld [vmem:[#allocation5 + $0x8] sm:$0xff]   ;;  %v466_v28 = vlaneseq }
  0x5e   : > { %1279 = vsyncadd (%p1783_p13), [#allocation6], 4294967040  ;;  %v356_v1 = vsel %vm355_vm0, %v352_v0, 0.0  ;;  %998 = vmatprep.subr.bf16.mxu0 %v1316_v8  ;;  %1002 = vmatprep.mubr.msk.bf16.mxu0 %vm1317_vm1, %v1316_v8  ;;  %v975_v14 = vld [vmem:[%s1757_s1] ss:$0 sm:$0xff]  ;;  %s1318_s13 = smov 104  }
  0x5f   : > { %357 = vadd.xlane.f32.xlu0 %v356_v1  ;;  %999 = vmatpush3.bf16.msra.mxu0 %v1102_v7  ;;  %v976_v16 = vld [vmem:[%s1758_s2] ss:$0 sm:$0xff]  ;;  %s1319_s17 = smov 120   ;;  %s1320_s22 = smov 112   ;;  %v1323_v26 = vmov 1983009808  }
  0x60   : > { %1000 = vmatprep.subr.bf16.mxu0 %v1316_v8  ;;  %v977_v20 = vld [vmem:[%s1760_s4] ss:$0 sm:$0xff]  ;;  %s1321_s8 = smov 96   ;;  %s1322_s12 = smov 64   ;;  %v464_v27 = vunpack.c.l.s4 %v1323_v26  ;;  %v1324_v29 = vmov 1934713408  }
  0x61   : > { %v496_v30 = vunpack.c.l.s4 %v1324_v29  ;;  %v467_v32 = vshrl.u32 %v466_v28, 7  ;;  %s1559_s20 = sshll.u32 %s1517_s15, 4  ;;  %vm537_vm2 = vcmask 58368   ;;  %s1581_s3 = sshll.u32 %s1302_s27, 8 }
  0x62   : > { %v465_v31 = vunpack.c.0.s8 %v464_v27  ;;  %s333_s16 = scalar_lea.vmem [#allocation7], %s1559_s20  ;;  %s1587_s18 = scalar_lea.hbm %s1761_s5, %s1581_s3 }
  0x63   : > { %1001 = vmatpush3.bf16.msra.mxu0 %v1103_v9  ;;  %v497_v35 = vunpack.c.0.s8 %v496_v30  ;;  %s764_s14 = sshll.u32 %s333_s16, 4  ;;  %s739_s19 = scalar_lea.sflag [#allocation4], %s1517_s15  ;;  %s1589_s14 = int_to_ptr.vmem [resolvable:$true] %s764_s14 }
  0x64   : > { %v1547_v36 = vsub.s32 %v465_v31, %v467_v32  ;;  %s1325_s27 = smov [#allocation7]  }
  0x65   : > { %v1551_v42 = vsub.s32 %v497_v35, %v467_v32 }
  0xec   : > { %v358_v2 = vpop.xlane.xlu0 %357 }
  0xed   : > { %v360_v3 = vmul.f32 0.03125, %v358_v2 }
  0xef   : > { %v361_v4 = vsub.f32 %v352_v0, %v360_v3 }
  0xf1   : > { %v362_v5 = vmul.f32 %v361_v4, %v361_v4 }
  0xf3   : > { %v363_v6 = vsel %vm355_vm0, %v362_v5, 0.0 }
  0xf4   : > { %364 = vadd.xlane.f32.xlu0 %v363_v6 }
 0x181   : > { %v365_v10 = vpop.xlane.xlu0 %364 }
 0x182   : > { %v366_v11 = vmul.f32 0.03125, %v365_v10 }
 0x184   : > { %v367_v12 = vadd.f32 1e-05, %v366_v11 }
 0x186   : > { %1104 = vrsqrt.f32 %v367_v12 }
 0x190   : > { %v1105_v13 = vpop.eup %1104 }
 0x191   : > { %v369_v15 = vmul.f32 %v1105_v13, %v361_v4 }
 0x193   : > { %v376_v17 = vmul.f32 %v975_v14, %v369_v15 }
 0x195   : > { %v383_v18 = vadd.f32 %v976_v16, %v376_v17 }
 0x197   : > { %v384_v19 = vpack.c.bf16 %v383_v18, %v383_v18 }
 0x199   : > { %1003 = vmatmul.mubr.msk.bf16.vlgmr.msra.gmra.mrb[0].mxu0 %vm355_vm0, %v384_v19 }
 0x26c   : > { %v445_v21 = vpop.f32.mrb[0].mxu0 }
 0x26d   : > { %v446_v22 = vadd.f32 %v977_v20, %v445_v21  ;;  %v1004_v23 = vpop.f32.mrb[1].mxu0 }
 0x26e   : > { %v448_v24 = vpop.f32.mrb[2].mxu0 }
 0x26f   : > { %458 = vrot.lane.b32.xlu0 %v446_v22, %s1318_s13  ;;  %452 = vrot.lane.b32.xlu1 %v446_v22, %s1319_s17  ;;  %v1005_v25 = vpop.f32.mrb[3].mxu0  ;;  %s1164_s13 = scalar_lea.vmem %s1589_s14, 256  ;;  %s1168_s17 = sshll.u32 %s1325_s27, 4  ;;  %s1169_s17 = int_to_ptr.vmem [resolvable:$false] %s1168_s17 }
 0x270   : > { %p1165_p6 = scmp.ne.s32.totalorder %s1589_s14, %s1164_s13  ;;  %p1171_p11 = scmp.lt.s32.totalorder %s1589_s14, %s1169_s17 }
 0x272   : > { %p1166_p8 = pnand %p1165_p6, %p1464_p10 }
 0x273   : > { %455 = vrot.lane.b32.xlu1 %v446_v22, %s1320_s22  ;;  %s1170_s22 = scalar_lea.vmem %s1169_s17, 512 }
 0x274   : > { %p1167_p12 = pneg %p1166_p8  ;;  %p1172_p0 = scmp.lt.s32.totalorder %s1170_s22, %s1164_s13 }
 0x276   : > { %p1173_p5 = por %p1172_p0, %p1171_p11 }
 0x277   : > { %546 = vrot.lane.b32.xlu1 %v446_v22, %s1321_s8 }
 0x278   : > { %p1174_p9 = pnand %p1173_p5, %p1167_p12 }
 0x27b   : > { %642 = vrot.lane.b32.xlu1 %v446_v22, %s1322_s12 }
 0x2e1   : > { %v459_v33 = vpop.permute.xlu0 %458  ;;  %v453_v34 = vpop.permute.xlu1 %452 }
 0x2e2   : > { %548 = vrot.lane.b32.xlu1 %v453_v34, %s1321_s8  ;;  %v477_v37 = vcombine.low %v453_v34, %v459_v33  ;;  %v478_v38 = vcombine.high %v453_v34, %v459_v33 }
 0x2e4   : > { %v485_v43 = vrot.slane %v477_v37, %v1547_v36  ;;  %v492_v44 = vrot.slane %v478_v38, %v1547_v36 }
 0x2e5   : > { %v456_v39 = vpop.permute.xlu1 %455 }
 0x2e6   : > { %v461_v40 = vcombine.low %v446_v22, %v456_v39  ;;  %v462_v41 = vcombine.high %v446_v22, %v456_v39  ;;  %646 = vrot.lane.b32.xlu0 %v456_v39, %s1322_s12  ;;  %550 = vrot.lane.b32.xlu1 %v456_v39, %s1321_s8 }
 0x2e8   : > { %v469_v45 = vrot.slane %v461_v40, %v1547_v36  ;;  %v476_v46 = vrot.slane %v462_v41, %v1547_v36 }
 0x2ea   : > { %v493_v47 = vcombine.low %v469_v45, %v485_v43  ;;  %v494_v48 = vcombine.high %v469_v45, %v485_v43  ;;  %v509_v49 = vcombine.low %v476_v46, %v492_v44  ;;  %v510_v50 = vcombine.high %v476_v46, %v492_v44  ;;  %552 = vrot.lane.b32.xlu1 %v459_v33, %s1321_s8 }
 0x2ec   : > { %v501_v51 = vrot.slane %v493_v47, %v1551_v42  ;;  %v508_v52 = vrot.slane %v494_v48, %v1551_v42  ;;  %v517_v53 = vrot.slane %v509_v49, %v1551_v42  ;;  %v524_v54 = vrot.slane %v510_v50, %v1551_v42 }
 0x2ee   : > { %v525_v55 = vcombine.high %v501_v51, %v1316_v8  ;;  %v526_v56 = vcombine.high %v508_v52, %v1316_v8  ;;  %v527_v57 = vcombine.high %v517_v53, %v1316_v8  ;;  %v528_v58 = vcombine.high %v524_v54, %v1316_v8  ;;  %644 = vrot.lane.b32.xlu1 %v453_v34, %s1322_s12 }
 0x2ef   : > { %v529_v59 = vpack.c.bf16 %v501_v51, %v501_v51  ;;  %v531_v60 = vpack.c.bf16 %v508_v52, %v508_v52  ;;  %v533_v61 = vpack.c.bf16 %v517_v53, %v517_v53  ;;  %v535_v62 = vpack.c.bf16 %v524_v54, %v524_v54 }
 0x2f0   : > { %v530_v63 = vpack.c.bf16 %v525_v55, %v525_v55  ;;  %v532_v0 = vpack.c.bf16 %v526_v56, %v526_v56  ;;  %v534_v1 = vpack.c.bf16 %v527_v57, %v527_v57  ;;  %v536_v2 = vpack.c.bf16 %v528_v58, %v528_v58 }
 0x2f1   : > { %538 = vst.msk [vmem:[%s333_s16] sm:$0x3] %vm537_vm2, %v529_v59  ;;  %540 = vst.msk [vmem:[%s333_s16 + $0x4] sm:$0x3] %vm537_vm2, %v531_v60 }
 0x2f2   : > { %542 = vst.msk [vmem:[%s333_s16 + $0x8] sm:$0x3] %vm537_vm2, %v533_v61  ;;  %544 = vst.msk [vmem:[%s333_s16 + $0xc] sm:$0x3] %vm537_vm2, %v535_v62  ;;  %648 = vrot.lane.b32.xlu1 %v459_v33, %s1322_s12 }
 0x2f3   : > { %539 = vst.msk [vmem:[%s333_s16 + $0x2] sm:$0x3] %vm537_vm2, %v530_v63  ;;  %541 = vst.msk [vmem:[%s333_s16 + $0x6] sm:$0x3] %vm537_vm2, %v532_v0 }
 0x2f4   : > { %543 = vst.msk [vmem:[%s333_s16 + $0xa] sm:$0x3] %vm537_vm2, %v534_v1  ;;  %545 = vst.msk [vmem:[%s333_s16 + $0xe] sm:$0x3] %vm537_vm2, %v536_v2 }
 0x2f5   : > { %1177 = shalt.err (!%p1174_p9)
}
 0x2f6   : > { %s1178_s8 = scalar_lea.hbm %s1587_s18, 256  ;;  %s1182_s9 = scalar_lea.hbm %s1761_s5, 512 }
 0x2f7   : > { %p1179_p1 = scmp.ne.s32.totalorder %s1587_s18, %s1178_s8  ;;  %p1183_p3 = scmp.lt.u32.totalorder %s1587_s18, %s1761_s5 }
 0x2f8   : > { %p1184_p4 = scmp.lt.u32.totalorder %s1182_s9, %s1178_s8  ;;  %p1186_p6 = scmp.lt.u32.totalorder %s1178_s8, %s1587_s18 }
 0x2f9   : > { %p1180_p2 = pnand %p1179_p1, %p1464_p10 }
 0x2fa   : > { %p1185_p13 = por %p1184_p4, %p1183_p3 }
 0x2fb   : > { %p1181_p7 = pneg %p1180_p2 }
 0x2fc   : > { %p1187_p8 = por %p1186_p6, %p1185_p13 }
 0x2fe   : > { %p1188_p12 = pnand %p1187_p8, %p1181_p7 }
 0x300   : > { %1191 = shalt.err (!%p1188_p12)
}
 0x301   : > { %s1326_s13 = smov 32   ;;  %s1327_s17 = smov 2   ;;  %v547_v3 = vpop.permute.xlu1 %546 }
 0x302   : > { %1012 = dma.vmem_to_hbm [thread:$0]  (%p1464_p10), %s1589_s14, 256, %s1587_s18, %s739_s19, %s1326_s13, %s1326_s13, %s1327_s17  }
 0x303   : > { %s743_s15 = sand.u32 1, %s1401_s30   ;;  %s340_s18 = scalar_lea.vmem [#allocation8], %s1559_s20 }
 0x304   : > { %s782_s14 = sshll.u32 %s340_s18, 4  ;;  %s1636_s8 = scalar_lea.hbm %s1762_s6, %s1581_s3  ;;  %s1638_s14 = int_to_ptr.vmem [resolvable:$true] %s782_s14 }
 0x305   : > { %v643_v4 = vpop.permute.xlu1 %642  ;;  %s1654_s12 = scalar_lea.sflag [#allocation9], %s743_s15  ;;  %s1192_s16 = scalar_lea.vmem %s1638_s14, 256 }
 0x306   : > { %p1193_p11 = scmp.ne.s32.totalorder %s1638_s14, %s1192_s16  ;;  %s1328_s9 = smov [#allocation8]  }
 0x307   : > { %s1196_s11 = sshll.u32 %s1328_s9, 4  ;;  %s1197_s11 = int_to_ptr.vmem [resolvable:$false] %s1196_s11 }
 0x308   : > { %p1194_p0 = pnand %p1193_p11, %p1464_p10  ;;  %s1198_s27 = scalar_lea.vmem %s1197_s11, 512 }
 0x309   : > { %p1199_p9 = scmp.lt.s32.totalorder %s1638_s14, %s1197_s11  ;;  %p1200_p1 = scmp.lt.s32.totalorder %s1198_s27, %s1192_s16 }
 0x30a   : > { %p1195_p5 = pneg %p1194_p0 }
 0x30b   : > { %p1201_p2 = por %p1200_p1, %p1199_p9 }
 0x30d   : > { %p1202_p7 = pnand %p1201_p2, %p1195_p5 }
 0x354   : > { %v549_v5 = vpop.permute.xlu1 %548 }
 0x358   : > { %v551_v6 = vpop.permute.xlu1 %550  ;;  %v647_v18 = vpop.permute.xlu0 %646 }
 0x359   : > { %v558_v7 = vcombine.low %v547_v3, %v551_v6  ;;  %v559_v9 = vcombine.high %v547_v3, %v551_v6  ;;  %v654_v27 = vcombine.low %v643_v4, %v647_v18  ;;  %v655_v28 = vcombine.high %v643_v4, %v647_v18 }
 0x35b   : > { %v566_v13 = vrot.slane %v558_v7, %v1547_v36  ;;  %v573_v14 = vrot.slane %v559_v9, %v1547_v36  ;;  %v662_v46 = vrot.slane %v654_v27, %v1547_v36  ;;  %v669_v47 = vrot.slane %v655_v28, %v1547_v36 }
 0x35c   : > { %v553_v10 = vpop.permute.xlu1 %552 }
 0x35d   : > { %v574_v11 = vcombine.low %v549_v5, %v553_v10  ;;  %v575_v12 = vcombine.high %v549_v5, %v553_v10 }
 0x35f   : > { %v582_v15 = vrot.slane %v574_v11, %v1547_v36  ;;  %v589_v16 = vrot.slane %v575_v12, %v1547_v36 }
 0x360   : > { %v645_v17 = vpop.permute.xlu1 %644 }
 0x361   : > { %v590_v19 = vcombine.low %v566_v13, %v582_v15  ;;  %v591_v20 = vcombine.high %v566_v13, %v582_v15  ;;  %v606_v21 = vcombine.low %v573_v14, %v589_v16  ;;  %v607_v22 = vcombine.high %v573_v14, %v589_v16 }
 0x363   : > { %v598_v23 = vrot.slane %v590_v19, %v1551_v42  ;;  %v605_v24 = vrot.slane %v591_v20, %v1551_v42  ;;  %v614_v25 = vrot.slane %v606_v21, %v1551_v42  ;;  %v621_v26 = vrot.slane %v607_v22, %v1551_v42 }
 0x364   : > { %v649_v33 = vpop.permute.xlu1 %648 }
 0x365   : > { %v622_v29 = vcombine.high %v598_v23, %v1316_v8  ;;  %v623_v30 = vcombine.high %v605_v24, %v1316_v8  ;;  %v624_v31 = vcombine.high %v614_v25, %v1316_v8  ;;  %v625_v32 = vcombine.high %v621_v26, %v1316_v8 }
 0x366   : > { %v626_v34 = vpack.c.bf16 %v598_v23, %v598_v23  ;;  %v628_v35 = vpack.c.bf16 %v605_v24, %v605_v24  ;;  %v630_v37 = vpack.c.bf16 %v614_v25, %v614_v25  ;;  %v632_v38 = vpack.c.bf16 %v621_v26, %v621_v26 }
 0x367   : > { %v627_v39 = vpack.c.bf16 %v622_v29, %v622_v29  ;;  %v629_v40 = vpack.c.bf16 %v623_v30, %v623_v30  ;;  %v631_v41 = vpack.c.bf16 %v624_v31, %v624_v31  ;;  %v633_v43 = vpack.c.bf16 %v625_v32, %v625_v32 }
 0x368   : > { %634 = vst.msk [vmem:[%s340_s18] sm:$0x3] %vm537_vm2, %v626_v34  ;;  %636 = vst.msk [vmem:[%s340_s18 + $0x4] sm:$0x3] %vm537_vm2, %v628_v35  ;;  %v670_v44 = vcombine.low %v645_v17, %v649_v33  ;;  %v671_v45 = vcombine.high %v645_v17, %v649_v33 }
 0x369   : > { %638 = vst.msk [vmem:[%s340_s18 + $0x8] sm:$0x3] %vm537_vm2, %v630_v37  ;;  %640 = vst.msk [vmem:[%s340_s18 + $0xc] sm:$0x3] %vm537_vm2, %v632_v38 }
 0x36a   : > { %635 = vst.msk [vmem:[%s340_s18 + $0x2] sm:$0x3] %vm537_vm2, %v627_v39  ;;  %637 = vst.msk [vmem:[%s340_s18 + $0x6] sm:$0x3] %vm537_vm2, %v629_v40  ;;  %v678_v48 = vrot.slane %v670_v44, %v1547_v36  ;;  %v685_v49 = vrot.slane %v671_v45, %v1547_v36 }
 0x36b   : > { %639 = vst.msk [vmem:[%s340_s18 + $0xa] sm:$0x3] %vm537_vm2, %v631_v41  ;;  %641 = vst.msk [vmem:[%s340_s18 + $0xe] sm:$0x3] %vm537_vm2, %v633_v43 }
 0x36c   : > { %1205 = shalt.err (!%p1202_p7)
}
 0x36d   : > { %s1206_s30 = scalar_lea.hbm %s1636_s8, 256  ;;  %s1210_s19 = scalar_lea.hbm %s1762_s6, 512 }
 0x36e   : > { %p1207_p3 = scmp.ne.s32.totalorder %s1636_s8, %s1206_s30  ;;  %p1211_p6 = scmp.lt.u32.totalorder %s1636_s8, %s1762_s6 }
 0x36f   : > { %p1212_p8 = scmp.lt.u32.totalorder %s1210_s19, %s1206_s30  ;;  %p1214_p11 = scmp.lt.u32.totalorder %s1206_s30, %s1636_s8 }
 0x370   : > { %p1208_p4 = pnand %p1207_p3, %p1464_p10 }
 0x371   : > { %p1213_p12 = por %p1212_p8, %p1211_p6 }
 0x372   : > { %p1209_p13 = pneg %p1208_p4 }
 0x373   : > { %p1215_p0 = por %p1214_p11, %p1213_p12 }
 0x375   : > { %p1216_p5 = pnand %p1215_p0, %p1209_p13 }
 0x377   : > { %1219 = shalt.err (!%p1216_p5)
}
 0x378   : > { %1013 = dma.vmem_to_hbm [thread:$0]  (%p1464_p10), %s1638_s14, 256, %s1636_s8, %s1654_s12, %s1326_s13, %s1326_s13, %s1327_s17   ;;  %v686_v36 = vcombine.low %v662_v46, %v678_v48  ;;  %v687_v50 = vcombine.high %v662_v46, %v678_v48  ;;  %v702_v51 = vcombine.low %v669_v47, %v685_v49  ;;  %v703_v52 = vcombine.high %v669_v47, %v685_v49 }
 0x379   : > { %s347_s16 = scalar_lea.vmem [#allocation10], %s1559_s20  ;;  %s1694_s8 = scalar_lea.hbm %s1763_s7, %s1581_s3 }
 0x37a   : > { %v694_v53 = vrot.slane %v686_v36, %v1551_v42  ;;  %v701_v54 = vrot.slane %v687_v50, %v1551_v42  ;;  %v710_v55 = vrot.slane %v702_v51, %v1551_v42  ;;  %v717_v56 = vrot.slane %v703_v52, %v1551_v42  ;;  %s800_s11 = sshll.u32 %s347_s16, 4  ;;  %s1329_s27 = smov [#allocation10]   ;;  %s1696_s11 = int_to_ptr.vmem [resolvable:$true] %s800_s11 }
 0x37b   : > { %s1220_s3 = scalar_lea.vmem %s1696_s11, 256  ;;  %s1224_s30 = sshll.u32 %s1329_s27, 4  ;;  %s1225_s30 = int_to_ptr.vmem [resolvable:$false] %s1224_s30 }
 0x37c   : > { %v718_v57 = vcombine.high %v694_v53, %v1316_v8  ;;  %v719_v58 = vcombine.high %v701_v54, %v1316_v8  ;;  %v720_v59 = vcombine.high %v710_v55, %v1316_v8  ;;  %v721_v60 = vcombine.high %v717_v56, %v1316_v8  ;;  %p1221_p9 = scmp.ne.s32.totalorder %s1696_s11, %s1220_s3  ;;  %s1226_s15 = scalar_lea.vmem %s1225_s30, 512 }
 0x37d   : > { %v722_v61 = vpack.c.bf16 %v694_v53, %v694_v53  ;;  %v724_v62 = vpack.c.bf16 %v701_v54, %v701_v54  ;;  %v726_v63 = vpack.c.bf16 %v710_v55, %v710_v55  ;;  %v728_v0 = vpack.c.bf16 %v717_v56, %v717_v56  ;;  %p1227_p7 = scmp.lt.s32.totalorder %s1696_s11, %s1225_s30  ;;  %p1228_p3 = scmp.lt.s32.totalorder %s1226_s15, %s1220_s3 }
 0x37e   : > { %v723_v1 = vpack.c.bf16 %v718_v57, %v718_v57  ;;  %v725_v2 = vpack.c.bf16 %v719_v58, %v719_v58  ;;  %v727_v3 = vpack.c.bf16 %v720_v59, %v720_v59  ;;  %v729_v4 = vpack.c.bf16 %v721_v60, %v721_v60  ;;  %p1222_p1 = pnand %p1221_p9, %p1464_p10 }
 0x37f   : > { %730 = vst.msk [vmem:[%s347_s16] sm:$0x3] %vm537_vm2, %v722_v61  ;;  %732 = vst.msk [vmem:[%s347_s16 + $0x4] sm:$0x3] %vm537_vm2, %v724_v62  ;;  %p1229_p4 = por %p1228_p3, %p1227_p7 }
 0x380   : > { %734 = vst.msk [vmem:[%s347_s16 + $0x8] sm:$0x3] %vm537_vm2, %v726_v63  ;;  %736 = vst.msk [vmem:[%s347_s16 + $0xc] sm:$0x3] %vm537_vm2, %v728_v0  ;;  %p1223_p2 = pneg %p1222_p1 }
 0x381   : > { %731 = vst.msk [vmem:[%s347_s16 + $0x2] sm:$0x3] %vm537_vm2, %v723_v1  ;;  %733 = vst.msk [vmem:[%s347_s16 + $0x6] sm:$0x3] %vm537_vm2, %v725_v2 }
 0x382   : > { %735 = vst.msk [vmem:[%s347_s16 + $0xa] sm:$0x3] %vm537_vm2, %v727_v3  ;;  %737 = vst.msk [vmem:[%s347_s16 + $0xe] sm:$0x3] %vm537_vm2, %v729_v4  ;;  %p1230_p13 = pnand %p1229_p4, %p1223_p2 }
 0x384   : > { %1233 = shalt.err (!%p1230_p13)
}
 0x385   : > { %s1234_s18 = scalar_lea.hbm %s1694_s8, 256  ;;  %s1238_s9 = scalar_lea.hbm %s1763_s7, 512 }
 0x386   : > { %p1235_p6 = scmp.ne.s32.totalorder %s1694_s8, %s1234_s18  ;;  %p1239_p11 = scmp.lt.u32.totalorder %s1694_s8, %s1763_s7 }
 0x387   : > { %p1240_p0 = scmp.lt.u32.totalorder %s1238_s9, %s1234_s18  ;;  %p1242_p9 = scmp.lt.u32.totalorder %s1234_s18, %s1694_s8 }
 0x388   : > { %p1236_p8 = pnand %p1235_p6, %p1464_p10 }
 0x389   : > { %p1241_p5 = por %p1240_p0, %p1239_p11 }
 0x38a   : > { %p1237_p12 = pneg %p1236_p8 }
 0x38b   : > { %p1243_p1 = por %p1242_p9, %p1241_p5 }
 0x38d   : > { %p1244_p2 = pnand %p1243_p1, %p1237_p12 }
 0x38f   : > { %1247 = shalt.err (!%p1244_p2)
}
 0x390   : > { %1014 = dma.vmem_to_hbm [thread:$0]  (%p1464_p10), %s1696_s11, 256, %s1694_s8, %s1654_s12, %s1326_s13, %s1326_s13, %s1327_s17  }
 0x391 PF: > { %s815_s20 = sand.u32 1, %s1290_s24   ;;  %p1784_p7 = scmp.ne.s32.totalorder %s1771_s10, 0 }
 0x392   : > { %p1785_p3 = scmp.ge.s32.totalorder %s1310_s29, 2  ;;  %s816_s3 = scalar_lea.sflag [#allocation4], %s815_s20 }
 0x394   : > { %p1027_p4 = pnand %p1785_p3, %p1784_p7 }
 0x396   : > { %1281 = dma.done.wait (!%p1027_p4), %s816_s3, 256  }
 0x397   : > { %1283 = vsyncadd (!%p1027_p4), %s816_s3, 4294967040  ;;  %s1786_s21 = sadd.s32 4294967294, %s1310_s29  }
 0x398   : > { %s824_s27 = sand.u32 1, %s1786_s21  }
 0x399   : > { %s825_s30 = scalar_lea.sflag [#allocation9], %s824_s27 }
 0x39a   : > { %1285 = dma.done.wait (!%p1027_p4), %s825_s30, 512  }
 0x39b   : > { %1287 = vsyncadd (!%p1027_p4), %s825_s30, 4294966784  ;;  %s28_s29 = sadd.s32 1, %s1310_s29   ;;  %s1787_s13 = sld [smem:[#allocation15_spill]] }
 0x39c   : > { %p25_p10 = scmp.ge.s32.totalorder %s28_s29, 4   ;;  %s1788_s24 = smov %s1294_s25 }
 0x39d   : > { %s1789_s25 = smov %s1298_s26  ;;  %s1790_s26 = smov %s1473_s23 }
 0x39e   : > { %s1791_s27 = smov %s1306_s28  ;;  %27 = sbr.rel (!%p25_p10) target bundleno = 11 (0xb), region = 121 }
 0x3a1   : > { %s1792_s28 = smov %s1787_s13 }
 0x3a5   :  { %839 = vsyncpa [#allocation3], 1 }
 0x3a6   :  { %841 = vsyncpa [#allocation3 + $0x1], 1 }
 0x3a7   :  { %842 = vsyncpa [#allocation6], 1 }
 0x3a8   :  { %843 = vsyncpa [#allocation4], 1 }
 0x3a9   :  { %845 = vsyncpa [#allocation4 + $0x1], 1 }
 0x3aa   :  { %846 = vsyncpa [#allocation9], 1 }
 0x3ab   :  { %848 = vsyncpa [#allocation9 + $0x1], 1 }

</bundles_post_ra>
